<compile_context>
chip_gen: v7x
topology: tpu7x:2x2x1
jax: 0.10.0
libtpu: 0.0.40
codegen_flags: <defaults>
</compile_context>

<pallas_src>
import functools

import jax
import jax.numpy as jnp
from jax import lax
from jax.experimental import pallas as pl
from jax.experimental.pallas import tpu as pltpu


# ----------------------------------------------------------------------------
# Spectrum / filter-bank construction (plain-JAX glue; eigh has no Pallas
# equivalent).
# ----------------------------------------------------------------------------
def compute_spectrum(W):
    """Eigendecomposition of the normalized graph Laplacian.

    W: (B, V, V) adjacency matrices. Returns (E, U): (B, V), (B, V, V).
    """
    diag = W.sum(axis=1)                                       # (B, V)
    # Clamp mirrors the reference: torch.max(torch.ones(...), diag).
    dhalf = 1.0 / jnp.sqrt(jnp.maximum(jnp.ones_like(diag), diag))
    Dh = jax.vmap(jnp.diag)(dhalf)                             # (B, V, V)
    V = W.shape[-1]
    Lap = jnp.eye(V, dtype=W.dtype)[None] - Dh @ W @ Dh
    E, U = jnp.linalg.eigh(Lap)
    return E, U


def filtering_matrices_stacked(W, J, lamb_max, R, d, dtype):
    """All F = J-1 filtering matrices in ONE fused einsum, emitted directly in
    the stacked kernel layout (B, F*V, V) and already in the MXU dtype."""
    E, U = compute_spectrum(W)                                 # (B,V), (B,V,V)
    B, V = E.shape
    F = J - 1
    js = jnp.arange(2, J + 1, dtype=E.dtype)                   # j in [2, J]
    centers = lamb_max * 2.0 ** (-(js - 1.0))                  # (F,)
    # Dyadic Gaussian band-pass (reference wavelet is `pass`).
    h = jnp.exp(-((E[None, :, :] * R / lamb_max - centers[:, None, None]) ** 2)
                / (2.0 * d[0] ** 2))                           # (F, B, V)
    g = jnp.einsum("bik,fbk,bjk->bfij", U, h, U)               # (B, F, V, V)
    return g.reshape(B, F * V, V).astype(dtype)


def filtering_matrices(W, J, lamb_max, R, d):
    """Per-j variant, (J-1, B, V, V) — used only by the pure-JAX reference."""
    E, U = compute_spectrum(W)

    def wavelet(lamb, j):
        center = lamb_max * (2.0 ** (-(j - 1)))
        return jnp.exp(-((lamb * R / lamb_max - center) ** 2) / (2.0 * d[0] ** 2))

    mats = []
    for j in range(2, J + 1):
        h = wavelet(E, j)
        mats.append(jnp.einsum("bik,bk,bjk->bij", U, h, U))
    return jnp.stack(mats)


# ----------------------------------------------------------------------------
# Pallas kernel: fused L-layer scattering for a block of `bt` batch elements.
#   g_ref : (bt, F*V, V)            stacked filter bank (MXU dtype)
#   f_ref : (bt, V, d_f)            input signals
#   o_ref : (bt, F*V, F**(L-1)*d_f) last-layer |.| coefficients
# ----------------------------------------------------------------------------
def _scattering_kernel(g_ref, f_ref, o_ref, *, F, V, L, bt):
    def one_batch(b, carry):
        g = g_ref[b]                                   # (F*V, V)
        u = f_ref[b].astype(jnp.float32)               # (V, n*d_f) signal slab
        for l in range(L):                             # static unroll on layers
            # One wide MXU matmul per layer, f32 accumulate, f32 abs (VPU).
            r = jnp.abs(jnp.dot(g, u.astype(g.dtype),
                                preferred_element_type=jnp.float32))
            if l == L - 1:
                o_ref[b] = r.astype(o_ref.dtype)
            else:
                # Filter-major repack: F sublane-aligned ROW slices + ONE lane
                # concat (op count F+1, independent of depth).  New column
                # block t = j*n + s; the reference (signal-major) order is
                # recovered wrapper-side by a digit-reversal transpose.
                u = jnp.concatenate(
                    [r[j * V:(j + 1) * V, :] for j in range(F)], axis=1)
        return carry

    lax.fori_loop(0, bt, one_batch, 0, unroll=True)


def scattering_apply(g_stacked, f, *, F, L, batch_block=None):
    """g_stacked: (B, F*V, V), f: (B, V, d_f) -> ((J-1)**L, B, V, d_f),
    ordered exactly like the reference double loop."""
    B, FV, V = g_stacked.shape
    assert FV == F * V
    d_f = f.shape[-1]
    n_out = F ** (L - 1)

    # Collapse the batch grid (one step for the toy B); set batch_block=B//2 on
    # v7x to give each of the two TensorCores a parallel grid step.
    bt = B if batch_block is None else batch_block
    assert B % bt == 0, "batch_block must divide B"
    grid = (B // bt,)

    kernel = functools.partial(_scattering_kernel, F=F, V=V, L=L, bt=bt)

    # Advisory cost estimate so XLA can overlap this (tiny) custom call with
    # the surrounding eigh / einsum filter construction.
    flops = 2 * B * sum(FV * V * (F ** l) * d_f for l in range(L))
    bytes_accessed = int(g_stacked.size * g_stacked.dtype.itemsize
                         + f.size * f.dtype.itemsize
                         + B * FV * n_out * d_f * f.dtype.itemsize)
    cost = pl.CostEstimate(flops=int(flops), transcendentals=0,
                           bytes_accessed=bytes_accessed)

    # VMEM budget: cover the (double-buffered) blocks, stay <= v7x 64 MiB.
    blk_bytes = bt * (FV * V * g_stacked.dtype.itemsize
                      + V * d_f * f.dtype.itemsize
                      + FV * n_out * d_f * f.dtype.itemsize)
    vmem_limit = int(min(64 << 20, max(32 << 20, 6 * blk_bytes)))
    # TODO(synk): for large V, add a K-tiling grid axis over V with an f32
    # accumulator scratch (pl.when init at k==0, abs+store at k==last) and/or
    # pipeline_mode=pl.Buffered(1) on g so the filter block fits VMEM
    # (v7x 64 MiB physical / v5e 16 MiB default scoped).
    # TODO(synk): at realistic sizes pick d_f / signal stacking so n_out*d_f is
    # a multiple of 128 lanes (unmasked, lane-dense stores).

    out = pl.pallas_call(
        kernel,
        out_shape=jax.ShapeDtypeStruct((B, FV, n_out * d_f), f.dtype),
        grid_spec=pltpu.PrefetchScalarGridSpec(
            num_scalar_prefetch=0,
            grid=grid,
            in_specs=[
                pl.BlockSpec((bt, FV, V), lambda i: (i, 0, 0)),
                pl.BlockSpec((bt, V, d_f), lambda i: (i, 0, 0)),
            ],
            out_specs=pl.BlockSpec((bt, FV, n_out * d_f), lambda i: (i, 0, 0)),
        ),
        compiler_params=pltpu.CompilerParams(
            dimension_semantics=("parallel",),
            vmem_limit_bytes=vmem_limit),
        cost_estimate=cost,
    )(g_stacked, f)

    # Kernel layout: row block = last-layer filter j_L; the column position
    # packs (j_{L-1}, ..., j_1) filter-major (j_{L-1} most significant).
    # Reference order has j_1 most significant -> digit-reversal transpose.
    out_r = out.reshape((B, F, V) + (F,) * (L - 1) + (d_f,))
    perm = tuple(range(3 + L - 2, 2, -1)) + (1, 0, 2, 3 + L - 1)
    return jnp.transpose(out_r, perm).reshape(F ** L, B, V, d_f)


# ----------------------------------------------------------------------------
# Full forward pass (mirrors scattering.forward)
# ----------------------------------------------------------------------------
@functools.partial(jax.jit, static_argnames=("J", "L", "mxu_dtype", "batch_block"))
def scattering_forward(W, f, *, J=4, L=2, lamb_max=2.0, R=3.0, d=(0.5, 0.5),
                       mxu_dtype=None, batch_block=None):
    F = J - 1
    g_dtype = mxu_dtype if mxu_dtype is not None else W.dtype
    g_stacked = filtering_matrices_stacked(W, J, lamb_max, R, d, dtype=g_dtype)
    return scattering_apply(g_stacked, f, F=F, L=L, batch_block=batch_block)


# ----------------------------------------------------------------------------
# Pure-JAX reference (mirrors the reference double loop) for correctness
# ----------------------------------------------------------------------------
def _reference_forward(W, f, *, J=4, L=2, lamb_max=2.0, R=3.0, d=(0.5, 0.5)):
    g = filtering_matrices(W, J, lamb_max, R, d)
    U_ = [f]
    for _ in range(L):
        U = list(U_)
        U_ = []
        for f_ in U:
            for g_j in g:
                U_.append(jnp.abs(g_j @ f_))
    return jnp.stack(U_)


if __name__ == "__main__":
    # Small shapes consistent with the module:
    #   batch B=2 graphs, V=16 nodes, d_f=8 node features, J=4, L=2
    B, V, d_f, J, L = 2, 16, 8, 4, 2

    key = jax.random.PRNGKey(0)
    kw, kf = jax.random.split(key)

    # Symmetric non-negative adjacency matrices, zero diagonal.
    A = jax.random.uniform(kw, (B, V, V), dtype=jnp.float32)
    W = (A + jnp.swapaxes(A, -1, -2)) * 0.5
    W = W * (1.0 - jnp.eye(V, dtype=jnp.float32))[None]

    f = jax.random.normal(kf, (B, V, d_f), dtype=jnp.float32)

    ref = _reference_forward(W, f, J=J, L=L)

    # f32-operand path (tight check against the pure-JAX reference).
    out = scattering_forward(W, f, J=J, L=L)
    out = jax.block_until_ready(out)
    assert out.shape == ((J - 1) ** L, B, V, d_f)
    assert jnp.allclose(out, ref, atol=1e-3, rtol=1e-3)

    # bf16 MXU-operand path: g cast wrapper-side; accumulate / abs / stored
    # output stay f32, so only operand rounding differs.
    out_bf16 = scattering_forward(W, f, J=J, L=L, mxu_dtype=jnp.bfloat16)
    out_bf16 = jax.block_until_ready(out_bf16)
    assert out_bf16.shape == ((J - 1) ** L, B, V, d_f)
    assert jnp.allclose(out_bf16, ref, atol=1e-1, rtol=1e-1)

    print("KERNEL_OK")
</pallas_src>

<mosaic_0001>
module attributes {stable_mosaic.version = 11 : i64} {
  func.func @_scattering_kernel(%arg0: i32, %arg1: memref<2x48x16xf32, #tpu.memory_space<vmem>>, %arg2: memref<2x16x8xf32, #tpu.memory_space<vmem>>, %arg3: memref<2x48x24xf32, #tpu.memory_space<vmem>>) attributes {dimension_semantics = [#tpu.dimension_semantics<parallel>], iteration_bounds = array<i64: 1>, scalar_prefetch = 0 : i64, scratch_operands = 0 : i64, tpu.core_type = #tpu.core_type<tc>, window_params = [{transform_indices = @transform_0, window_bounds = array<i64: 2, 48, 16>}, {transform_indices = @transform_1, window_bounds = array<i64: 2, 16, 8>}, {transform_indices = @transform_2, window_bounds = array<i64: 2, 48, 24>}]} {
    %c0_i32 = arith.constant 0 : i32
    %0 = arith.index_cast %c0_i32 : i32 to index
    %c0 = arith.constant 0 : index
    %c0_0 = arith.constant 0 : index
    %1 = vector.load %arg1[%0, %c0, %c0_0] : memref<2x48x16xf32, #tpu.memory_space<vmem>>, vector<1x48x16xf32>
    %2 = vector.shape_cast %1 : vector<1x48x16xf32> to vector<48x16xf32>
    %3 = arith.index_cast %c0_i32 : i32 to index
    %c0_1 = arith.constant 0 : index
    %c0_2 = arith.constant 0 : index
    %4 = vector.load %arg2[%3, %c0_1, %c0_2] : memref<2x16x8xf32, #tpu.memory_space<vmem>>, vector<1x16x8xf32>
    %5 = vector.shape_cast %4 : vector<1x16x8xf32> to vector<16x8xf32>
    %cst = arith.constant dense<0.000000e+00> : vector<48x8xf32>
    %6 = tpu.matmul %2, %5, %cst {dimension_numbers = #tpu.dot_dimension_numbers<[1], [0], [0], [1], [0, 0, 1, 1], [], []>} : vector<48x16xf32>, vector<16x8xf32>, vector<48x8xf32> -> vector<48x8xf32>
    %7 = math.absf %6 : vector<48x8xf32>
    %8 = vector.extract_strided_slice %7 {offsets = [0, 0], sizes = [16, 8], strides = [1, 1]} : vector<48x8xf32> to vector<16x8xf32>
    %9 = vector.extract_strided_slice %7 {offsets = [16, 0], sizes = [16, 8], strides = [1, 1]} : vector<48x8xf32> to vector<16x8xf32>
    %10 = vector.extract_strided_slice %7 {offsets = [32, 0], sizes = [16, 8], strides = [1, 1]} : vector<48x8xf32> to vector<16x8xf32>
    %11 = tpu.concatenate %8, %9, %10 in 1 : vector<16x8xf32>, vector<16x8xf32>, vector<16x8xf32> -> vector<16x24xf32>
    %cst_3 = arith.constant dense<0.000000e+00> : vector<48x24xf32>
    %12 = tpu.matmul %2, %11, %cst_3 {dimension_numbers = #tpu.dot_dimension_numbers<[1], [0], [0], [1], [0, 0, 1, 1], [], []>} : vector<48x16xf32>, vector<16x24xf32>, vector<48x24xf32> -> vector<48x24xf32>
    %13 = math.absf %12 : vector<48x24xf32>
    %14 = arith.index_cast %c0_i32 : i32 to index
    %c0_4 = arith.constant 0 : index
    %c0_5 = arith.constant 0 : index
    %15 = vector.load %arg3[%14, %c0_4, %c0_5] : memref<2x48x24xf32, #tpu.memory_space<vmem>>, vector<1x48x24xf32>
    %16 = vector.shape_cast %15 : vector<1x48x24xf32> to vector<48x24xf32>
    %17 = vector.shape_cast %13 : vector<48x24xf32> to vector<1x48x24xf32>
    tpu.vector_store %arg3[%14, %c0_4, %c0_5], %17 {strides = array<i32>} : memref<2x48x24xf32, #tpu.memory_space<vmem>>, vector<1x48x24xf32>,
    %c1_i32 = arith.constant 1 : i32
    %18 = arith.index_cast %c1_i32 : i32 to index
    %c0_6 = arith.constant 0 : index
    %c0_7 = arith.constant 0 : index
    %19 = vector.load %arg1[%18, %c0_6, %c0_7] : memref<2x48x16xf32, #tpu.memory_space<vmem>>, vector<1x48x16xf32>
    %20 = vector.shape_cast %19 : vector<1x48x16xf32> to vector<48x16xf32>
    %21 = arith.index_cast %c1_i32 : i32 to index
    %c0_8 = arith.constant 0 : index
    %c0_9 = arith.constant 0 : index
    %22 = vector.load %arg2[%21, %c0_8, %c0_9] : memref<2x16x8xf32, #tpu.memory_space<vmem>>, vector<1x16x8xf32>
    %23 = vector.shape_cast %22 : vector<1x16x8xf32> to vector<16x8xf32>
    %cst_10 = arith.constant dense<0.000000e+00> : vector<48x8xf32>
    %24 = tpu.matmul %20, %23, %cst_10 {dimension_numbers = #tpu.dot_dimension_numbers<[1], [0], [0], [1], [0, 0, 1, 1], [], []>} : vector<48x16xf32>, vector<16x8xf32>, vector<48x8xf32> -> vector<48x8xf32>
    %25 = math.absf %24 : vector<48x8xf32>
    %26 = vector.extract_strided_slice %25 {offsets = [0, 0], sizes = [16, 8], strides = [1, 1]} : vector<48x8xf32> to vector<16x8xf32>
    %27 = vector.extract_strided_slice %25 {offsets = [16, 0], sizes = [16, 8], strides = [1, 1]} : vector<48x8xf32> to vector<16x8xf32>
    %28 = vector.extract_strided_slice %25 {offsets = [32, 0], sizes = [16, 8], strides = [1, 1]} : vector<48x8xf32> to vector<16x8xf32>
    %29 = tpu.concatenate %26, %27, %28 in 1 : vector<16x8xf32>, vector<16x8xf32>, vector<16x8xf32> -> vector<16x24xf32>
    %cst_11 = arith.constant dense<0.000000e+00> : vector<48x24xf32>
    %30 = tpu.matmul %20, %29, %cst_11 {dimension_numbers = #tpu.dot_dimension_numbers<[1], [0], [0], [1], [0, 0, 1, 1], [], []>} : vector<48x16xf32>, vector<16x24xf32>, vector<48x24xf32> -> vector<48x24xf32>
    %31 = math.absf %30 : vector<48x24xf32>
    %32 = arith.index_cast %c1_i32 : i32 to index
    %c0_12 = arith.constant 0 : index
    %c0_13 = arith.constant 0 : index
    %33 = vector.load %arg3[%32, %c0_12, %c0_13] : memref<2x48x24xf32, #tpu.memory_space<vmem>>, vector<1x48x24xf32>
    %34 = vector.shape_cast %33 : vector<1x48x24xf32> to vector<48x24xf32>
    %35 = vector.shape_cast %31 : vector<48x24xf32> to vector<1x48x24xf32>
    tpu.vector_store %arg3[%32, %c0_12, %c0_13], %35 {strides = array<i32>} : memref<2x48x24xf32, #tpu.memory_space<vmem>>, vector<1x48x24xf32>,
    %c2_i32 = arith.constant 2 : i32
    return
  }
  func.func @transform_0(%arg0: i32) -> (i32, i32, i32) {
    %c0_i32 = arith.constant 0 : i32
    %c0_i32_0 = arith.constant 0 : i32
    %c0_i32_1 = arith.constant 0 : i32
    return %arg0, %c0_i32, %c0_i32_0 : i32, i32, i32
  }
  func.func @transform_1(%arg0: i32) -> (i32, i32, i32) {
    %c0_i32 = arith.constant 0 : i32
    %c0_i32_0 = arith.constant 0 : i32
    %c0_i32_1 = arith.constant 0 : i32
    return %arg0, %c0_i32, %c0_i32_0 : i32, i32, i32
  }
  func.func @transform_2(%arg0: i32) -> (i32, i32, i32) {
    %c0_i32 = arith.constant 0 : i32
    %c0_i32_0 = arith.constant 0 : i32
    %c0_i32_1 = arith.constant 0 : i32
    return %arg0, %c0_i32, %c0_i32_0 : i32, i32, i32
  }
}

</mosaic_0001>

<bundles_post_ra>
// kernel: custom-call.2
= control target key start
LH: loop header
LB: loop body
LE: loop exit
PB: predicated region body
PF: predicated region fallthrough
CT: control target
= control target key end

     0   :  { %s1672_s30 = smov 0   ;;  %s1674_s10 = smov 0   ;;  %s1981_s0 = inlined_call_operand.vmem [shape: f32[2,8,8], index: 0, kind: input, shape index: {}]   ;;  %s1982_s1 = inlined_call_operand.vmem [shape: f32[2,8,8], index: 1, kind: input, shape index: {}]   ;;  %s1983_s2 = inlined_call_operand.vmem [shape: f32[2,8,8], index: 2, kind: input, shape index: {}]   ;;  %s1984_s3 = inlined_call_operand.vmem [shape: f32[2,8,8], index: 3, kind: input, shape index: {}]   ;;  %s1985_s4 = inlined_call_operand.vmem [shape: f32[2,8], index: 4, kind: output, shape index: {0}]   ;;  %s1986_s5 = inlined_call_operand.vmem [shape: f32[2,8], index: 5, kind: output, shape index: {1}]   ;;  %s1987_s6 = inlined_call_operand.vmem [shape: f32[2,8,8], index: 6, kind: output, shape index: {2}]   ;;  %s1988_s7 = inlined_call_operand.vmem [shape: f32[2,8,8], index: 7, kind: output, shape index: {3}]   ;;  %s1989_s8 = inlined_call_operand.vmem [shape: f32[2,8,8], index: 8, kind: output, shape index: {4}]   ;;  %s1990_s9 = inlined_call_operand.vmem [shape: f32[2,8,8], index: 9, kind: output, shape index: {5}]  }
   0x1   :  { %s1676_s11 = smov 0  }
   0x2 LB: > { %s1688_s12 = sadd.s32 4294967295, %s1609_s11   ;;  %s1691_s13 = sadd.s32 1, %s1609_s11   ;;  %s1609_s11 = sphi %s1676_s11, %s1999_s11   ;;  %s1605_s10 = sphi %s1674_s10, %s1998_s10   ;;  %s1601_s30 = sphi %s1672_s30, %s1997_s30  }
   0x3   : > { %s20_s14 = sshrl.u32 %s1609_s11, 3  ;;  %s21_s15 = sshrl.u32 %s1691_s13, 3 }
   0x4   : > { %s22_s16 = ssub.s32 %s20_s14, %s21_s15  ;;  %s25_s17 = sadd.s32 1, %s1605_s10 }
   0x5   : > { %p23_p0 = scmp.eq.s32.totalorder %s22_s16, 0  ;;  %p35_p1 = scmp.ne.s32.totalorder %s1605_s10, %s1601_s30 }
   0x6   : > { %p36_p2 = scmp.eq.s32.totalorder %s1688_s12, 1  ;;  %p1470_p4 = scmp.ge.s32.totalorder %s1609_s11, 2 }
   0x7   : > { %s1700_s18 = scalar_select %p23_p0, %s1605_s10, %s25_s17  }
   0x8   : > { %p1702_p3 = por %p36_p2, %p35_p1  ;;  %86 = sbr.rel (%p1470_p4) target bundleno = 17 (0x11), region = 16 }
   0x9   : > { %1991 = sst [smem:[#allocation25_spill]] %s1700_s18  ;;  %s88_s20 = sand.u32 (!%p1470_p4), 1, %s1609_s11  }
   0xa   : > { %s1472_s21 = sshll.u32 (!%p1470_p4), %s1609_s11, 3  ;;  %s1471_s22 = sshll.u32 (!%p1470_p4), %s88_s20, 3 }
   0xb   : > { %s92_s25 = scalar_lea.vmem (!%p1470_p4), %s1981_s0, %s1472_s21  ;;  %s90_s26 = scalar_lea.vmem (!%p1470_p4), [#allocation0], %s1471_s22 }
   0xc   : > { %v120_v0 = vld [vmem:[%s92_s25] sm:$0xff] (!%p1470_p4)  ;;  %s130_s29 = scalar_lea.vmem (!%p1470_p4), %s1982_s1, %s1472_s21  ;;  %s168_s16 = scalar_lea.vmem (!%p1470_p4), %s1983_s2, %s1472_s21 }
   0xd   : > { %121 = vst [vmem:[%s90_s26] sm:$0xff] (!%p1470_p4), %v120_v0  ;;  %v158_v1 = vld [vmem:[%s130_s29] sm:$0xff] (!%p1470_p4)  ;;  %s128_s17 = scalar_lea.vmem (!%p1470_p4), [#allocation1], %s1471_s22  ;;  %s206_s23 = scalar_lea.vmem (!%p1470_p4), %s1984_s3, %s1472_s21 }
   0xe   : > { %159 = vst [vmem:[%s128_s17] sm:$0xff] (!%p1470_p4), %v158_v1  ;;  %v196_v2 = vld [vmem:[%s168_s16] sm:$0xff] (!%p1470_p4)  ;;  %s166_s24 = scalar_lea.vmem (!%p1470_p4), [#allocation2], %s1471_s22  ;;  %s204_s25 = scalar_lea.vmem (!%p1470_p4), [#allocation3], %s1471_s22 }
   0xf   : > { %197 = vst [vmem:[%s166_s24] sm:$0xff] %v196_v2  ;;  %v234_v3 = vld [vmem:[%s206_s23] sm:$0xff] }
  0x10   : > { %235 = vst [vmem:[%s204_s25] sm:$0xff] %v234_v3 }
  0x11 PF: > { %p1479_p5 = scmp.ge.s32.totalorder %s1609_s11, 1  ;;  %p240_p6 = scmp.lt.s32.totalorder %s1609_s11, 3 }
  0x13   : > { %p241_p7 = pnand %p1479_p5, %p240_p6 }
  0x15   : > { %244 = sbr.rel (%p241_p7) target bundleno = 992 (0x3e0), region = 156 }
  0x1c   : > { %s247_s26 = sand.u32 1, %s1688_s12   ;;  %s281_s27 = sand.u32 1, %s1601_s30   ;;  %v325_v4 = vlaneseq  ;;  %v1619_v11 = vmov 0.0  }
  0x1d   : > { %s1480_s28 = sshll.u32 %s247_s26, 3  ;;  %s1725_s18 = sshll.u32 %s281_s27, 1 }
  0x1e   : > { %v1727_v5 = vand.u32 127, %v325_v4  ;;  %v1729_v6 = vshrl.u32 %v325_v4, 7  ;;  %s249_s21 = scalar_lea.vmem [#allocation0], %s1480_s28  ;;  %s253_s22 = scalar_lea.vmem [#allocation1], %s1480_s28 }
  0x1f   : > { %v309_v7 = vld [vmem:[%s249_s21] sm:$0xff]  ;;  %v312_v8 = vld [vmem:[%s253_s22] sm:$0xff]  ;;  %s257_s29 = scalar_lea.vmem [#allocation2], %s1480_s28  ;;  %s261_s11 = scalar_lea.vmem [#allocation3], %s1480_s28 }
  0x20   : > { %v315_v9 = vld [vmem:[%s257_s29] sm:$0xff]  ;;  %v318_v10 = vld [vmem:[%s261_s11] sm:$0xff]  ;;  %s1731_s14 = scalar_lea.vmem [#allocation8], %s1480_s28  ;;  %s1734_s30 = scalar_lea.vmem [#allocation9], %s1480_s28  ;;  %v327_v5 = vmov %v1727_v5  ;;  %v330_v6 = vmov %v1729_v6  ;;  %vm1359_vm2 = vcmp.lt.s32.totalorder %v1727_v5, 8 }
  0x21   : > { %320 = vst [vmem:[%s1731_s14] sm:$0xff] %v1619_v11  ;;  %321 = vst [vmem:[%s1734_s30] sm:$0xff] %v1619_v11  ;;  %s308_s15 = smov [#allocation12]  ;;  %s311_s16 = smov [#allocation13]  ;;  %v340_v5 = vmov %v1727_v5  ;;  %v343_v6 = vmov %v1729_v6  ;;  %vm334_vm0 = vcmp.eq.s32.totalorder %v330_v6, %v327_v5 }
  0x22   : > { %s1737_s17 = scalar_lea.vmem [#allocation10], %s1480_s28  ;;  %s1740_s20 = scalar_lea.vmem [#allocation11], %s1480_s28  ;;  %310 = vst [vmem:[%s308_s15] sm:$0xff] %v309_v7  ;;  %313 = vst [vmem:[%s311_s16] sm:$0xff] %v312_v8  ;;  %vm347_vm1 = vcmp.eq.s32.totalorder %v343_v6, %v340_v5  ;;  %v1351_v5 = vmov %v1727_v5  ;;  %v1354_v6 = vmov %v1729_v6 }
  0x23   : > { %322 = vst [vmem:[%s1737_s17] sm:$0xff] %v1619_v11  ;;  %323 = vst [vmem:[%s1740_s20] sm:$0xff] %v1619_v11  ;;  %s314_s23 = smov [#allocation14]  ;;  %s317_s24 = smov [#allocation15]  ;;  %vm1364_vm3 = vcmp.eq.s32.totalorder %v1354_v6, %v1351_v5  ;;  %v1402_v5 = vmov %v1727_v5  ;;  %v1371_v6 = vmov %v1729_v6 }
  0x24   : > { %316 = vst [vmem:[%s314_s23] sm:$0xff] %v315_v9  ;;  %319 = vst [vmem:[%s317_s24] sm:$0xff] %v318_v10  ;;  %s324_s14 = smov %s1731_s14  ;;  %s337_s20 = smov %s1740_s20  ;;  %v1368_v5 = vmov %v1727_v5  ;;  %v1405_v6 = vmov %v1729_v6 }
  0x25   : > { %s283_s25 = scalar_lea.vmem [#allocation5], %s1725_s18  ;;  %s1355_s27 = smov [#allocation12]  ;;  %v1385_v5 = vmov %v1727_v5  ;;  %v1388_v6 = vmov %v1729_v6  ;;  %vm1415_vm4 = vcmp.eq.s32.totalorder %v1405_v6, %v1402_v5 }
  0x26   : > { %s1372_s28 = smov [#allocation13]  ;;  %s1389_s21 = smov [#allocation14] }
  0x27   : > { %s1406_s22 = smov [#allocation15] }
  0x28   : > { %v331_v12 = vld [vmem:[%s324_s14] sm:$0xff] }
  0x29   : > { %v335_v13 = vsel %vm334_vm0, 1.0, %v331_v12  ;;  %v1361_v16 = vld [vmem:[%s1355_s27] sm:$0xff] }
  0x2a   : > { %v344_v14 = vld [vmem:[%s337_s20] sm:$0xff]  ;;  %336 = vst [vmem:[%s324_s14] sm:$0xff] %v335_v13  ;;  %v1362_v18 = vsel %vm1359_vm2, %v1361_v16, 0.0 }
  0x2b   : > { %v348_v15 = vsel %vm347_vm1, 1.0, %v344_v14  ;;  %v1378_v17 = vld [vmem:[%s1372_s28] sm:$0xff]  ;;  %v1363_v22 = vmul.f32 %v1362_v18, %v1362_v18 }
  0x2c   : > { %349 = vst [vmem:[%s337_s20] sm:$0xff] %v348_v15  ;;  %v1379_v19 = vsel %vm1359_vm2, %v1378_v17, 0.0  ;;  %v1395_v20 = vld [vmem:[%s1389_s21] sm:$0xff] }
  0x2d   : > { %v1412_v21 = vld [vmem:[%s1406_s22] sm:$0xff]  ;;  %v1380_v23 = vmul.f32 %v1379_v19, %v1379_v19  ;;  %v1396_v24 = vsel %vm1359_vm2, %v1395_v20, 0.0  ;;  %v1365_v29 = vsel %vm1364_vm3, 0.0, %v1363_v22 }
  0x2e   : > { %v1413_v25 = vsel %vm1359_vm2, %v1412_v21, 0.0  ;;  %v1397_v26 = vmul.f32 %v1396_v24, %v1396_v24 }
  0x2f   : > { %v1382_v27 = vadd.f32 %v1380_v23, %v1363_v22  ;;  %v1414_v28 = vmul.f32 %v1413_v25, %v1413_v25  ;;  %v1381_v30 = vadd.f32 %v1380_v23, %v1365_v29 }
  0x31   : > { %v1399_v31 = vadd.f32 %v1397_v26, %v1382_v27  ;;  %v1398_v32 = vadd.f32 %v1397_v26, %v1381_v30  ;;  %v1416_v33 = vsel %vm1415_vm4, 0.0, %v1414_v28 }
  0x33   : > { %v1418_v34 = vadd.f32 %v1414_v28, %v1399_v31  ;;  %v1417_v35 = vadd.f32 %v1416_v33, %v1398_v32 }
  0x35   : > { %1419 = vadd.xlane.f32.xlu0 %v1418_v34 }
  0x39   : > { %1427 = vadd.xlane.f32.xlu0 %v1417_v35 }
  0xc2   : > { %v1420_v36 = vpop.xlane.xlu0 %1419 }
  0xc3   : > { %v1421_v37 = vrot.slane %v1420_v36, 4 }
  0xc5   : > { %v1422_v38 = vadd.f32 %v1421_v37, %v1420_v36 }
  0xc6   : > { %v1428_v39 = vpop.xlane.xlu0 %1427 }
  0xc7   : > { %v1423_v40 = vrot.slane %v1422_v38, 2  ;;  %v1429_v41 = vrot.slane %v1428_v39, 4 }
  0xc9   : > { %v1430_v42 = vadd.f32 %v1429_v41, %v1428_v39  ;;  %v1424_v43 = vadd.f32 %v1423_v40, %v1422_v38 }
  0xcb   : > { %v1431_v44 = vrot.slane %v1430_v42, 2  ;;  %v1425_v46 = vrot.slane %v1424_v43, 1 }
  0xcd   : > { %v1432_v45 = vadd.f32 %v1431_v44, %v1430_v42  ;;  %v1426_v49 = vadd.f32 %v1425_v46, %v1424_v43 }
  0xcf   : > { %v1433_v47 = vrot.slane %v1432_v45, 1 }
  0xd1   : > { %v1434_v48 = vadd.f32 %v1433_v47, %v1432_v45 }
  0xd3   : > { %1520 = vpush %v1434_v48 }
  0xd4   : > { %1522 = vpush %v1426_v49 }
 0x104   : > { %s1521_s29 = spop %1520 }
 0x105   : > { %s1523_s11 = spop %1522 }
 0x106   : > { %s1437_s15 = smul.f32 1e-10, %s1523_s11 }
 0x108   : > { %p1438_p8 = scmp.le.f32.partialorder %s1521_s29, %s1437_s15 }
 0x109   : > { %s1769_s16 = smov (!%p1438_p8), 0  }
 0x10a   : > { %1441 = sbr.rel (%p1438_p8) target bundleno = 948 (0x3b4), region = 499 }
 0x111 LB: >> { %s1774_s23 = smov 0   ;;  %s1613_s16 = sphi %s1769_s16, %s1993_s16  }
 0x112 LB: >>> { %s454_s24 = smov [#allocation12]  ;;  %v458_v5 = vmov %v1727_v5  ;;  %v461_v6 = vmov %v1729_v6  ;;  %s474_s27 = smov [#allocation13]  ;;  %vm777_vm14 = vcmp.eq.s32.totalorder %v1729_v6, 0  ;;  %vm789_vm15 = vcmp.eq.s32.totalorder %v1729_v6, 7  ;;  %s1617_s23 = sphi %s1774_s23, %s453_s23  }
 0x113   : >>> { %v478_v5 = vmov %v1727_v5  ;;  %v481_v6 = vmov %v1729_v6  ;;  %v462_v50 = vld [vmem:[%s454_s24] sm:$0xff]  ;;  %vm465_vm5 = vcmp.eq.s32.totalorder %v461_v6, %v458_v5  ;;  %s494_s28 = smov [#allocation15]  ;;  %s455_s21 = smov [#allocation16] }
 0x114   : >>> { %vm485_vm6 = vcmp.eq.s32.totalorder %v481_v6, %v478_v5  ;;  %v498_v5 = vmov %v1727_v5  ;;  %v501_v6 = vmov %v1729_v6  ;;  %v466_v51 = vsel %vm465_vm5, %v462_v50, 0.0  ;;  %v482_v52 = vld [vmem:[%s474_s27] sm:$0xff]  ;;  %s475_s22 = smov [#allocation17]  ;;  %s495_s29 = smov [#allocation18] }
 0x115   : >>> { %vm505_vm7 = vcmp.eq.s32.totalorder %v501_v6, %v498_v5  ;;  %v467_v53 = vrot.slane %v466_v51, 4  ;;  %v486_v54 = vsel %vm485_vm6, %v482_v52, 0.0  ;;  %v502_v55 = vld [vmem:[%s494_s28] sm:$0xff]  ;;  %s518_s11 = smov [#allocation17]  ;;  %s516_s15 = smov [#allocation16]  ;;  %v567_v5 = vmov %v1727_v5 }
 0x116   : >>> { %v487_v56 = vrot.slane %v486_v54, 4  ;;  %v506_v57 = vsel %vm505_vm7, %v502_v55, 0.0  ;;  %s520_s24 = smov [#allocation18]  ;;  %s555_s27 = smov [#allocation19]  ;;  %v570_v6 = vmov %v1729_v6  ;;  %v582_v5 = vmov %v1727_v5 }
 0x117   : >>> { %v468_v58 = vadd.f32 %v467_v53, %v466_v51  ;;  %v507_v59 = vrot.slane %v506_v57, 4  ;;  %s557_s28 = smov [#allocation20]  ;;  %v585_v6 = vmov %v1729_v6  ;;  %vm572_vm12 = vcmp.eq.s32.totalorder %v570_v6, %v567_v5  ;;  %s1796_s14 = smov %s1731_s14 }
 0x118   : >>> { %v488_v60 = vadd.f32 %v487_v56, %v486_v54  ;;  %vm587_vm13 = vcmp.eq.s32.totalorder %v585_v6, %v582_v5  ;;  %s1799_s30 = smov %s1734_s30  ;;  %s1802_s17 = smov %s1737_s17  ;;  %v825_v52 = vld [vmem:[%s1796_s14] sm:$0xff]  ;;  %v680_v5 = vmov %v1727_v5  ;;  %v683_v6 = vmov %v1729_v6 }
 0x119   : >>> { %v469_v61 = vrot.slane %v468_v58, 2  ;;  %v508_v62 = vadd.f32 %v507_v59, %v506_v57  ;;  %s1806_s20 = smov %s1740_s20  ;;  %v826_v53 = vld [vmem:[%s1799_s30] sm:$0xff]  ;;  %s819_s26 = smov [#allocation24]  ;;  %v653_v5 = vmov %v1727_v5  ;;  %v656_v6 = vmov %v1729_v6 }
 0x11a   : >>> { %v489_v63 = vrot.slane %v488_v60, 2  ;;  %v827_v56 = vld [vmem:[%s1802_s17] sm:$0xff]  ;;  %v694_v5 = vmov %v1727_v5  ;;  %v697_v6 = vmov %v1729_v6  ;;  %vm687_vm0 = vcmp.eq.s32.totalorder %v683_v6, %v680_v5  ;;  %s453_s23 = sadd.s32 1, %s1617_s23  }
 0x11b   : >>> { %v470_v0 = vadd.f32 %v469_v61, %v468_v58  ;;  %v509_v1 = vrot.slane %v508_v62, 2  ;;  %v828_v57 = vld [vmem:[%s1806_s20] sm:$0xff]  ;;  %v667_v5 = vmov %v1727_v5  ;;  %v670_v6 = vmov %v1729_v6  ;;  %p450_p9 = scmp.ge.s32.totalorder %s453_s23, 15  }
 0x11c   : >>> { %v490_v2 = vadd.f32 %v489_v63, %v488_v60  ;;  %vm661_vm1 = vcmp.eq.s32.totalorder %v656_v6, %v653_v5  ;;  %vm702_vm3 = vcmp.eq.s32.totalorder %v697_v6, %v694_v5  ;;  %vm674_vm4 = vcmp.eq.s32.totalorder %v670_v6, %v667_v5 }
 0x11d   : >>> { %v471_v3 = vrot.slane %v470_v0, 1  ;;  %v510_v4 = vadd.f32 %v509_v1, %v508_v62  ;;  %vm716_vm5 = vcmp.eq.s32.totalorder %v1727_v5, 0  ;;  %vm720_vm6 = vcmp.eq.s32.totalorder %v1727_v5, 1 }
 0x11e   : >>> { %v491_v7 = vrot.slane %v490_v2, 1  ;;  %vm733_vm7 = vcmp.eq.s32.totalorder %v1727_v5, 7  ;;  %v354_v5 = vmov (%p450_p9), %v1727_v5  ;;  %v357_v6 = vmov (%p450_p9), %v1729_v6 }
 0x11f   : >>> { %v472_v8 = vadd.f32 %v471_v3, %v470_v0  ;;  %v511_v9 = vrot.slane %v510_v4, 1  ;;  %v407_v5 = vmov (%p450_p9), %v1727_v5 }
 0x120   : >>> { %v492_v10 = vadd.f32 %v491_v7, %v490_v2 }
 0x121   : >>> { %473 = vst [vmem:[%s455_s21] sm:$0x1] %v472_v8  ;;  %v512_v11 = vadd.f32 %v511_v9, %v510_v4  ;;  %s514_s21 = smov [#allocation21] }
 0x122   : >>> { %493 = vst [vmem:[%s475_s22] sm:$0x1] %v492_v10  ;;  %s515_s22 = smov [#allocation22]  ;;  %s559_s21 = smov %s514_s21 }
 0x123   : >>> { %513 = vst [vmem:[%s495_s29] sm:$0x1] %v512_v11  ;;  %s561_s22 = smov %s515_s22  ;;  %s563_s29 = smov [#allocation21] }
 0x128   : >>> { %v517_v14 = vld [vmem:[%s516_s15] sm:$0xff]  ;;  %s576_s15 = smov [#allocation23] }
 0x129   : >>> { %v519_v12 = vld [vmem:[%s518_s11] sm:$0xff]  ;;  %v540_v27 = vand.u32 2147483647, %v517_v14  ;;  %s578_s11 = smov [#allocation22] }
 0x12a   : >>> { %v523_v13 = vmul.f32 2.0, %v519_v12  ;;  %v521_v15 = vld [vmem:[%s520_s24] sm:$0xff]  ;;  %v541_v32 = vand.u32 2147483647, %v519_v12  ;;  %s593_s24 = smov [#allocation23] }
 0x12b   : >>> { %v522_v16 = vsub.f32 %v521_v15, %v517_v14  ;;  %v542_v28 = vand.u32 2147483647, %v521_v15 }
 0x12c   : >>> { %1571 = vrcp.f32 %v523_v13 }
 0x12d   : >>> { %v543_v31 = vmin.f32 %v540_v27, %v542_v28 }
 0x12f   : >>> { %v544_v33 = vmul.f32 1.1920929e-08, %v543_v31 }
 0x131   : >>> { %vm545_vm11 = vcmp.le.f32.partialorder %v541_v32, %v544_v33 }
 0x136   : >>> { %v1572_v17 = vpop.eup %1571 }
 0x137   : >>> { %v525_v18 = vmul.f32 %v1572_v17, %v522_v16 }
 0x139   : >>> { %v527_v19 = vmul.f32 %v525_v18, %v525_v18  ;;  %vm526_vm10 = vcmp.ge.f32.partialorder %v525_v18, 0.0 }
 0x13b   : >>> { %v528_v20 = vadd.f32 1.0, %v527_v19 }
 0x13d   : >>> { %1573 = vrsqrt.f32 %v528_v20  ;;  %vm531_vm8 = vcmp.eq.f32.partialorder %v528_v20, inf  ;;  %v534_v22 = vand.u32 2147483648, %v528_v20  ;;  %vm533_vm9 = vcmp.eq.f32.partialorder %v528_v20, 0.0 }
 0x147   : >>> { %v1574_v21 = vpop.eup %1573 }
 0x148   : >>> { %v530_v23 = vmul.f32 %v1574_v21, %v528_v20 }
 0x14a   : >>> { %v532_v24 = vsel %vm531_vm8, %v528_v20, %v530_v23  ;;  %vm369_vm8 = vcmp.eq.s32.totalorder (%p450_p9), %v357_v6, %v354_v5  ;;  %v410_v6 = vmov (%p450_p9), %v1729_v6  ;;  %v373_v5 = vmov (%p450_p9), %v1727_v5 }
 0x14b   : >>> { %v535_v25 = vsel %vm533_vm9, %v534_v22, %v532_v24  ;;  %v376_v6 = vmov (%p450_p9), %v1729_v6  ;;  %v390_v5 = vmov (%p450_p9), %v1727_v5  ;;  %vm422_vm9 = vcmp.eq.s32.totalorder (%p450_p9), %v410_v6, %v407_v5 }
 0x14c   : >>> { %v536_v26 = vxor.u32 2147483648, %v535_v25  ;;  %v393_v6 = vmov (%p450_p9), %v1729_v6 }
 0x14e   : >>> { %v537_v29 = vsel %vm526_vm10, %v535_v25, %v536_v26 }
 0x14f   : >>> { %v538_v30 = vadd.f32 %v537_v29, %v525_v18 }
 0x151   : >>> { %1575 = vrcp.f32 %v538_v30 }
 0x15b   : >>> { %v1576_v34 = vpop.eup %1575 }
 0x15c   : >>> { %v546_v35 = vsel %vm545_vm11, 0.0, %v1576_v34 }
 0x15d   : >>> { %v547_v36 = vmul.f32 %v546_v35, %v546_v35  ;;  %v551_v37 = vmul.f32 %v546_v35, %v519_v12 }
 0x15f   : >>> { %v548_v38 = vadd.f32 1.0, %v547_v36  ;;  %v552_v39 = vsub.f32 %v517_v14, %v551_v37  ;;  %v554_v40 = vadd.f32 %v551_v37, %v521_v15 }
 0x161   : >>> { %1577 = vrsqrt.f32 %v548_v38  ;;  %556 = vst [vmem:[%s555_s27] sm:$0xff] %v552_v39  ;;  %558 = vst [vmem:[%s557_s28] sm:$0xff] %v554_v40  ;;  %s1789_s27 = smov [#allocation12]  ;;  %s591_s28 = smov [#allocation24] }
 0x162   : >>> { %v601_v49 = vld [vmem:[%s1789_s27] sm:$0xff] }
 0x16b   : >>> { %v1578_v41 = vpop.eup %1577 }
 0x16c   : >>> { %560 = vst [vmem:[%s559_s21] sm:$0xff] %v1578_v41  ;;  %v550_v42 = vmul.f32 %v1578_v41, %v546_v35  ;;  %s1791_s21 = smov [#allocation13] }
 0x16d   : >>> { %v602_v50 = vld [vmem:[%s1791_s21] sm:$0xff] }
 0x16e   : >>> { %562 = vst [vmem:[%s561_s22] sm:$0xff] %v550_v42  ;;  %s1793_s22 = smov [#allocation15] }
 0x16f   : >>> { %v604_v51 = vld [vmem:[%s1793_s22] sm:$0xff] }
 0x173   : >>> { %v564_v43 = vld [vmem:[%s563_s29] ss:$0 sm:$0xff]  ;;  %s817_s29 = smov [#allocation23] }
 0x174   : >>> { %v573_v44 = vsel %vm572_vm12, %v564_v43, 0.0 }
 0x175   : >>> { %574 = vadd.xlane.f32.xlu0 %v573_v44  ;;  %v579_v45 = vld [vmem:[%s578_s11] ss:$0 sm:$0xff]  ;;  %s1808_s11 = smov [#allocation14] }
 0x176   : >>> { %v588_v46 = vsel %vm587_vm13, %v579_v45, 0.0  ;;  %v603_v58 = vld [vmem:[%s1808_s11] sm:$0xff] }
 0x179   : >>> { %589 = vadd.xlane.f32.xlu0 %v588_v46 }
 0x202   : >>> { %v575_v47 = vpop.xlane.xlu0 %574 }
 0x203   : >>> { %577 = vst [vmem:[%s576_s15] sm:$0xff] %v575_v47  ;;  %s595_s15 = smov [#allocation24] }
 0x206   : >>> { %v590_v48 = vpop.xlane.xlu0 %589 }
 0x207   : >>> { %592 = vst [vmem:[%s591_s28] sm:$0xff] %v590_v48  ;;  %s1835_s28 = smov [#allocation14] }
 0x20a   : >>> { %v594_v54 = vld [vmem:[%s593_s24] sm:$0xff]  ;;  %s623_s24 = smov [#allocation22] }
 0x20b   : >>> { %v818_v55 = vld [vmem:[%s817_s29] sm:$0xff]  ;;  %v605_v59 = vmul.f32 %v601_v49, %v594_v54  ;;  %v608_v60 = vmul.f32 %v602_v50, %v594_v54  ;;  %v615_v61 = vmul.f32 %v604_v51, %v594_v54  ;;  %v612_v4 = vmul.f32 %v603_v58, %v594_v54  ;;  %s650_s29 = smov [#allocation19] }
 0x20c   : >>> { %v829_v62 = vmul.f32 %v825_v52, %v818_v55  ;;  %v832_v63 = vmul.f32 %v826_v53, %v818_v55  ;;  %v836_v0 = vmul.f32 %v827_v56, %v818_v55  ;;  %v839_v1 = vmul.f32 %v828_v57, %v818_v55  ;;  %v624_v24 = vld [vmem:[%s623_s24] ss:$0 sm:$0xff]  ;;  %s690_s24 = smov [#allocation15] }
 0x20d   : >>> { %v657_v55 = vld [vmem:[%s650_s29] ss:$0 sm:$0xff]  ;;  %s706_s29 = smov [#allocation13] }
 0x20e   : >>> { %v596_v2 = vld [vmem:[%s595_s15] sm:$0xff]  ;;  %s677_s15 = smov [#allocation14] }
 0x20f   : >>> { %v820_v3 = vld [vmem:[%s819_s26] sm:$0xff]  ;;  %v609_v7 = vmul.f32 %v604_v51, %v596_v2  ;;  %v611_v8 = vmul.f32 %v601_v49, %v596_v2  ;;  %v614_v9 = vmul.f32 %v602_v50, %v596_v2  ;;  %v606_v14 = vmul.f32 %v603_v58, %v596_v2  ;;  %s621_s26 = smov [#allocation21] }
 0x210   : >>> { %v830_v10 = vmul.f32 %v827_v56, %v820_v3  ;;  %v833_v11 = vmul.f32 %v828_v57, %v820_v3  ;;  %v835_v12 = vmul.f32 %v825_v52, %v820_v3  ;;  %v838_v13 = vmul.f32 %v826_v53, %v820_v3  ;;  %v622_v23 = vld [vmem:[%s621_s26] ss:$0 sm:$0xff]  ;;  %s649_s26 = smov [#allocation12] }
 0x211   : >>> { %v610_v15 = vsub.f32 %v608_v60, %v609_v7  ;;  %v616_v16 = vadd.f32 %v615_v61, %v614_v9  ;;  %v613_v18 = vadd.f32 %v612_v4, %v611_v8  ;;  %v607_v22 = vsub.f32 %v605_v59, %v606_v14 }
 0x212   : >>> { %v831_v17 = vsub.f32 %v829_v62, %v830_v10  ;;  %v834_v19 = vsub.f32 %v832_v63, %v833_v11  ;;  %v837_v20 = vadd.f32 %v836_v0, %v835_v12  ;;  %v840_v21 = vadd.f32 %v839_v1, %v838_v13 }
 0x213   : >>> { %618 = vst [vmem:[%s1791_s21] sm:$0xff] %v610_v15  ;;  %620 = vst [vmem:[%s1793_s22] sm:$0xff] %v616_v16  ;;  %s1837_s21 = smov [#allocation15]  ;;  %s1841_s22 = smov [#allocation13] }
 0x214   : >>> { %841 = vst [vmem:[%s1796_s14] sm:$0xff] %v831_v17  ;;  %619 = vst [vmem:[%s1808_s11] sm:$0xff] %v613_v18  ;;  %s845_s14 = smov %s1731_s14  ;;  %s691_s11 = smov [#allocation20] }
 0x215   : >>> { %842 = vst [vmem:[%s1799_s30] sm:$0xff] %v834_v19  ;;  %843 = vst [vmem:[%s1802_s17] sm:$0xff] %v837_v20  ;;  %s846_s17 = smov %s1737_s17  ;;  %s1828_s30 = smov %s1734_s30  ;;  %v698_v56 = vld [vmem:[%s691_s11] ss:$0 sm:$0xff] }
 0x216   : >>> { %844 = vst [vmem:[%s1806_s20] sm:$0xff] %v840_v21  ;;  %617 = vst [vmem:[%s1789_s27] sm:$0xff] %v607_v22  ;;  %s1831_s20 = smov %s1740_s20  ;;  %s1839_s27 = smov [#allocation12] }
 0x217   : >>> { %s1621_s11 = smov 127  }
 0x21a   : >>> { %v632_v39 = vld [vmem:[%s1837_s21] sm:$0xff] }
 0x21b   : >>> { %v847_v25 = vld [vmem:[%s845_s14] ss:$0 sm:$0xff]  ;;  %v1499_v27 = vld [vmem:[%s845_s14 + $0x7] ss:$0 sm:$0xff]  ;;  %v640_v42 = vmul.f32 %v632_v39, %v624_v24  ;;  %v643_v46 = vmul.f32 %v632_v39, %v622_v23 }
 0x21c   : >>> { %v1498_v26 = vld [vmem:[%s845_s14 - $0x1] sm:$0xfe]  ;;  %v1503_v34 = vld [vmem:[%s1828_s30 + $0x7] ss:$0 sm:$0xff] }
 0x21d   : >>> { %v854_v28 = vsel %vm777_vm14, %v847_v25, %v1498_v26  ;;  %v858_v29 = vld [vmem:[%s846_s17] ss:$0 sm:$0xff]  ;;  %v1501_v30 = vld [vmem:[%s846_s17 + $0x1] sm:$0x7f] }
 0x21e   : >>> { %v871_v31 = vld [vmem:[%s1828_s30] ss:$0 sm:$0xff]  ;;  %857 = vst [vmem:[%s845_s14] sm:$0xff] %v854_v28  ;;  %v866_v32 = vsel %vm789_vm15, %v1499_v27, %v1501_v30  ;;  %v1505_v37 = vld [vmem:[%s1831_s20 + $0x1] sm:$0x7f] }
 0x21f   : >>> { %v1502_v33 = vld [vmem:[%s1828_s30 - $0x1] sm:$0xfe]  ;;  %1500 = vst [vmem:[%s845_s14 + $0x1] sm:$0x1] %v858_v29  ;;  %868 = vst [vmem:[%s846_s17] sm:$0xff] %v866_v32  ;;  %v890_v40 = vsel %vm789_vm15, %v1503_v34, %v1505_v37 }
 0x220   : >>> { %v882_v35 = vld [vmem:[%s1831_s20] ss:$0 sm:$0xff]  ;;  %v878_v36 = vsel %vm777_vm14, %v871_v31, %v1502_v33 }
 0x221   : >>> { %v631_v38 = vld [vmem:[%s1835_s28] sm:$0xff]  ;;  %881 = vst [vmem:[%s1828_s30] sm:$0xff] %v878_v36  ;;  %892 = vst [vmem:[%s1831_s20] sm:$0xff] %v890_v40 }
 0x222   : >>> { %v639_v41 = vmul.f32 %v631_v38, %v622_v23  ;;  %v642_v43 = vmul.f32 %v631_v38, %v624_v24  ;;  %v629_v44 = vld [vmem:[%s1839_s27] sm:$0xff]  ;;  %1504 = vst [vmem:[%s1828_s30 + $0x1] sm:$0x1] %v882_v35 }
 0x223   : >>> { %v630_v45 = vld [vmem:[%s1841_s22] sm:$0xff]  ;;  %v633_v47 = vmul.f32 %v629_v44, %v622_v23  ;;  %v636_v49 = vmul.f32 %v629_v44, %v624_v24 }
 0x224   : >>> { %v634_v48 = vmul.f32 %v630_v45, %v624_v24  ;;  %v641_v50 = vsub.f32 %v639_v41, %v640_v42  ;;  %v637_v51 = vmul.f32 %v630_v45, %v622_v23  ;;  %v644_v52 = vadd.f32 %v643_v46, %v642_v43 }
 0x226   : >>> { %v635_v53 = vsub.f32 %v633_v47, %v634_v48  ;;  %647 = vst [vmem:[%s1835_s28] sm:$0xff] %v641_v50  ;;  %v638_v54 = vadd.f32 %v637_v51, %v636_v49  ;;  %648 = vst [vmem:[%s1837_s21] sm:$0xff] %v644_v52  ;;  %s664_s28 = smov [#allocation13]  ;;  %s1875_s21 = smov [#allocation14] }
 0x228   : >>> { %645 = vst [vmem:[%s1839_s27] sm:$0xff] %v635_v53  ;;  %646 = vst [vmem:[%s1841_s22] sm:$0xff] %v638_v54  ;;  %s705_s27 = smov [#allocation12]  ;;  %s1620_s22 = smov 1  }
 0x22d   : >>> { %v684_v57 = vld [vmem:[%s677_s15] sm:$0xff] }
 0x22e   : >>> { %v688_v58 = vsel %vm687_vm0, 0.0, %v684_v57  ;;  %v699_v60 = vld [vmem:[%s690_s24] sm:$0xff] }
 0x22f   : >>> { %v658_v59 = vld [vmem:[%s649_s26] sm:$0xff]  ;;  %689 = vst [vmem:[%s677_s15] sm:$0xff] %v688_v58  ;;  %v703_v63 = vsel %vm702_vm3, %v698_v56, %v699_v60  ;;  %s1878_s15 = smov [#allocation15] }
 0x230   : >>> { %v662_v61 = vsel %vm661_vm1, %v657_v55, %v658_v59  ;;  %v671_v62 = vld [vmem:[%s664_s28] sm:$0xff]  ;;  %704 = vst [vmem:[%s690_s24] sm:$0xff] %v703_v63  ;;  %s793_s24 = smov [#allocation13] }
 0x231   : >>> { %663 = vst [vmem:[%s649_s26] sm:$0xff] %v662_v61  ;;  %v675_v0 = vsel %vm674_vm4, 0.0, %v671_v62  ;;  %s769_s26 = smov [#allocation12] }
 0x232   : >>> { %676 = vst [vmem:[%s664_s28] sm:$0xff] %v675_v0  ;;  %s770_s28 = smov [#allocation14] }
 0x236   : >>> { %v743_v1 = vld [vmem:[%s1875_s21] sm:$0xff] }
 0x237   : >>> { %744 = vrot.lane.b32.xlu0 %v743_v1, %s1620_s22  ;;  %v739_v4 = vld [vmem:[%s1878_s15] sm:$0xff] }
 0x238   : >>> { %v711_v2 = vld [vmem:[%s705_s27] sm:$0xff] }
 0x239   : >>> { %712 = vrot.lane.b32.xlu1 %v711_v2, %s1620_s22  ;;  %v707_v3 = vld [vmem:[%s706_s29] sm:$0xff] }
 0x23d   : >>> { %708 = vrot.lane.b32.xlu1 %v707_v3, %s1620_s22 }
 0x241   : >>> { %729 = vrot.lane.b32.xlu1 %v707_v3, %s1621_s11 }
 0x245   : >>> { %740 = vrot.lane.b32.xlu1 %v739_v4, %s1620_s22  ;;  %s358_s22 = smov (%p450_p9), [#allocation12] }
 0x249   : >>> { %761 = vrot.lane.b32.xlu1 %v739_v4, %s1621_s11  ;;  %s394_s11 = smov (%p450_p9), [#allocation14] }
 0x2a9   : >>> { %v745_v13 = vpop.permute.xlu0 %744 }
 0x2aa   : >>> { %v749_v15 = vsel %vm716_vm5, %v743_v1, %v745_v13 }
 0x2ab   : >>> { %v713_v7 = vpop.permute.xlu1 %712 }
 0x2ac   : >>> { %v717_v8 = vsel %vm716_vm5, %v711_v2, %v713_v7 }
 0x2af   : >>> { %v709_v9 = vpop.permute.xlu1 %708 }
 0x2b0   : >>> { %v721_v10 = vsel %vm720_vm6, %v709_v9, %v717_v8 }
 0x2b1   : >>> { %v727_v11 = vsel %vm1359_vm2, %v721_v10, 0.0 }
 0x2b2   : >>> { %735 = vst [vmem:[%s705_s27] sm:$0xff] %v727_v11  ;;  %s794_s27 = smov [#allocation15] }
 0x2b3   : >>> { %v730_v12 = vpop.permute.xlu1 %729 }
 0x2b4   : >>> { %v734_v14 = vsel %vm733_vm7, %v711_v2, %v730_v12 }
 0x2b5   : >>> { %736 = vst [vmem:[%s706_s29] sm:$0xff] %v734_v14  ;;  %s377_s29 = smov (%p450_p9), [#allocation13] }
 0x2b7   : >>> { %v741_v16 = vpop.permute.xlu1 %740 }
 0x2b8   : >>> { %v753_v17 = vsel %vm720_vm6, %v741_v16, %v749_v15 }
 0x2b9   : >>> { %v771_v18 = vld [vmem:[%s769_s26] ss:$0 sm:$0xff]  ;;  %v1491_v20 = vld [vmem:[%s769_s26 + $0x7] ss:$0 sm:$0xff]  ;;  %v759_v22 = vsel %vm1359_vm2, %v753_v17, 0.0 }
 0x2ba   : >>> { %v1490_v19 = vld [vmem:[%s769_s26 - $0x1] sm:$0xfe]  ;;  %767 = vst [vmem:[%s1875_s21] sm:$0xff] %v759_v22  ;;  %s893_s21 = sadd.s32 (%p450_p9), 1, %s1613_s16  }
 0x2bb   : >>> { %v778_v21 = vsel %vm777_vm14, %v771_v18, %v1490_v19  ;;  %v762_v23 = vpop.permute.xlu1 %761  ;;  %p446_p10 = scmp.ge.s32.totalorder (%p450_p9), %s893_s21, 15  ;;  %s1993_s16 = smov (%p450_p9), %s893_s21 }
 0x2bc   : >>> { %781 = vst [vmem:[%s769_s26] sm:$0xff] %v778_v21  ;;  %v795_v24 = vld [vmem:[%s793_s24] ss:$0 sm:$0xff]  ;;  %v1495_v26 = vld [vmem:[%s793_s24 + $0x7] ss:$0 sm:$0xff]  ;;  %v766_v27 = vsel %vm733_vm7, %v743_v1, %v762_v23 }
 0x2bd   : >>> { %v1494_v25 = vld [vmem:[%s793_s24 - $0x1] sm:$0xfe]  ;;  %768 = vst [vmem:[%s1878_s15] sm:$0xff] %v766_v27  ;;  %s411_s15 = smov (%p450_p9), [#allocation15] }
 0x2be   : >>> { %v802_v28 = vsel %vm777_vm14, %v795_v24, %v1494_v25 }
 0x2bf   : >>> { %805 = vst [vmem:[%s793_s24] sm:$0xff] %v802_v28 }
 0x2c1   : >>> { %v782_v29 = vld [vmem:[%s770_s28] ss:$0 sm:$0xff]  ;;  %v1493_v30 = vld [vmem:[%s770_s28 + $0x1] sm:$0x7f] }
 0x2c2   : >>> { %1492 = vst [vmem:[%s769_s26 + $0x1] sm:$0x1] %v782_v29  ;;  %v790_v31 = vsel %vm789_vm15, %v1491_v20, %v1493_v30  ;;  %452 = sbr.rel (!%p450_p9) target bundleno = 274 (0x112), region = 494 }
 0x2c3   : >>> { %792 = vst [vmem:[%s770_s28] sm:$0xff] %v790_v31 }
 0x2c4   : >>> { %v806_v32 = vld [vmem:[%s794_s27] ss:$0 sm:$0xff]  ;;  %v1497_v33 = vld [vmem:[%s794_s27 + $0x1] sm:$0x7f] }
 0x2c5   : >>> { %1496 = vst [vmem:[%s793_s24 + $0x1] sm:$0x1] %v806_v32  ;;  %v814_v34 = vsel %vm789_vm15, %v1495_v26, %v1497_v33 }
 0x2c6   : >>> { %816 = vst [vmem:[%s794_s27] sm:$0xff] %v814_v34 }
 0x2c9   : >> { %v364_v35 = vld [vmem:[%s358_s22] sm:$0xff] }
 0x2ca   : >> { %v365_v37 = vsel %vm1359_vm2, %v364_v35, 0.0  ;;  %v400_v39 = vld [vmem:[%s394_s11] sm:$0xff] }
 0x2cb   : >> { %v366_v41 = vmul.f32 %v365_v37, %v365_v37  ;;  %v401_v43 = vsel %vm1359_vm2, %v400_v39, 0.0 }
 0x2cc   : >> { %v383_v36 = vld [vmem:[%s377_s29] sm:$0xff]  ;;  %v402_v45 = vmul.f32 %v401_v43, %v401_v43 }
 0x2cd   : >> { %v384_v38 = vsel %vm1359_vm2, %v383_v36, 0.0  ;;  %v417_v40 = vld [vmem:[%s411_s15] sm:$0xff]  ;;  %v370_v48 = vsel %vm369_vm8, 0.0, %v366_v41 }
 0x2ce   : >> { %v385_v42 = vmul.f32 %v384_v38, %v384_v38  ;;  %v418_v44 = vsel %vm1359_vm2, %v417_v40, 0.0 }
 0x2cf   : >> { %v419_v47 = vmul.f32 %v418_v44, %v418_v44 }
 0x2d0   : >> { %v387_v46 = vadd.f32 %v385_v42, %v366_v41  ;;  %v386_v49 = vadd.f32 %v385_v42, %v370_v48 }
 0x2d1   : >> { %v423_v52 = vsel %vm422_vm9, 0.0, %v419_v47 }
 0x2d2   : >> { %v404_v50 = vadd.f32 %v402_v45, %v387_v46  ;;  %v403_v51 = vadd.f32 %v402_v45, %v386_v49 }
 0x2d4   : >> { %v425_v53 = vadd.f32 %v419_v47, %v404_v50  ;;  %v424_v54 = vadd.f32 %v423_v52, %v403_v51 }
 0x2d6   : >> { %426 = vadd.xlane.f32.xlu0 %v425_v53 }
 0x2da   : >> { %434 = vadd.xlane.f32.xlu0 %v424_v54 }
 0x363   : >> { %v427_v55 = vpop.xlane.xlu0 %426 }
 0x364   : >> { %v428_v56 = vrot.slane %v427_v55, 4 }
 0x366   : >> { %v429_v57 = vadd.f32 %v428_v56, %v427_v55 }
 0x367   : >> { %v435_v58 = vpop.xlane.xlu0 %434 }
 0x368   : >> { %v430_v59 = vrot.slane %v429_v57, 2  ;;  %v436_v60 = vrot.slane %v435_v58, 4 }
 0x36a   : >> { %v437_v61 = vadd.f32 %v436_v60, %v435_v58  ;;  %v431_v62 = vadd.f32 %v430_v59, %v429_v57 }
 0x36c   : >> { %v438_v63 = vrot.slane %v437_v61, 2  ;;  %v432_v1 = vrot.slane %v431_v62, 1 }
 0x36e   : >> { %v439_v0 = vadd.f32 %v438_v63, %v437_v61  ;;  %v433_v4 = vadd.f32 %v432_v1, %v431_v62 }
 0x370   : >> { %v440_v2 = vrot.slane %v439_v0, 1 }
 0x372   : >> { %v441_v3 = vadd.f32 %v440_v2, %v439_v0 }
 0x374   : >> { %1524 = vpush %v441_v3 }
 0x375   : >> { %1526 = vpush %v433_v4 }
 0x3a5   : >> { %s1525_s23 = spop %1524 }
 0x3a6   : >> { %s1527_s26 = spop %1526 }
 0x3a7   : >> { %s444_s24 = smul.f32 1e-10, %s1527_s26 }
 0x3a9   : >> { %p445_p11 = scmp.le.f32.partialorder %s1525_s23, %s444_s24 }
 0x3ab   : >> { %p447_p12 = por %p446_p10, %p445_p11 }
 0x3ad   : > { %895 = sbr.rel (!%p447_p12) target bundleno = 273 (0x111), region = 505 }
 0x3b4 PF: > { %s900_s28 = smov [#allocation12]  ;;  %v904_v5 = vmov %v1727_v5  ;;  %v907_v6 = vmov %v1729_v6  ;;  %s920_s27 = smov [#allocation15] }
 0x3b5   : > { %v924_v5 = vmov %v1727_v5  ;;  %v927_v6 = vmov %v1729_v6  ;;  %v908_v7 = vld [vmem:[%s900_s28] sm:$0xff]  ;;  %vm911_vm10 = vcmp.eq.s32.totalorder %v907_v6, %v904_v5  ;;  %s896_s16 = sand.u32 7, %s1688_s12   ;;  %s1994_s29 = scalar_lea.vmem [#allocation7], %s1725_s18 }
 0x3b6   : > { %vm931_vm11 = vcmp.eq.s32.totalorder %v927_v6, %v924_v5  ;;  %v912_v8 = vsel %vm911_vm10, %v908_v7, 0.0  ;;  %v928_v10 = vld [vmem:[%s920_s27] sm:$0xff]  ;;  %s897_s21 = scalar_lea.vmem [#allocation4], %s896_s16  ;;  %s899_s22 = scalar_lea.vmem [#allocation6], %s896_s16 }
 0x3b7   : > { %v913_v9 = vrot.slane %v912_v8, 4  ;;  %v932_v11 = vsel %vm931_vm11, %v928_v10, 0.0  ;;  %s901_s21 = smov %s897_s21  ;;  %s921_s22 = smov %s899_s22 }
 0x3b8   : > { %v933_v13 = vrot.slane %v932_v11, 4  ;;  %s979_s11 = sshrl.u32 (%p1702_p3), %s1688_s12, 3 }
 0x3b9   : > { %v914_v12 = vadd.f32 %v913_v9, %v912_v8  ;;  %s1512_s15 = sshll.u32 (%p1702_p3), %s979_s11, 1 }
 0x3ba   : > { %v934_v15 = vadd.f32 %v933_v13, %v932_v11  ;;  %s981_s24 = scalar_lea.vmem (%p1702_p3), %s1985_s4, %s1512_s15 }
 0x3bb   : > { %v915_v14 = vrot.slane %v914_v12, 2 }
 0x3bc   : > { %v935_v17 = vrot.slane %v934_v15, 2 }
 0x3bd   : > { %v916_v16 = vadd.f32 %v915_v14, %v914_v12 }
 0x3be   : > { %v936_v19 = vadd.f32 %v935_v17, %v934_v15 }
 0x3bf   : > { %v917_v18 = vrot.slane %v916_v16, 1 }
 0x3c0   : > { %v937_v5 = vrot.slane %v936_v19, 1 }
 0x3c1   : > { %v918_v20 = vadd.f32 %v917_v18, %v916_v16 }
 0x3c2   : > { %v938_v6 = vadd.f32 %v937_v5, %v936_v19 }
 0x3c3   : > { %919 = vst [vmem:[%s901_s21] sm:$0x1] %v918_v20 }
 0x3c4   : > { %939 = vst [vmem:[%s921_s22] sm:$0x1] %v938_v6 }
 0x3c6   : > { %978 = sbr.rel (!%p1702_p3) target bundleno = 980 (0x3d4), region = 174 }
 0x3ca   : > { %v943_v21 = vld [vmem:[#allocation4] sm:$0x3] }
 0x3cb   : > { %945 = vst [vmem:[%s283_s25] sm:$0x3] %v943_v21  ;;  %v949_v22 = vld [vmem:[#allocation6] sm:$0x3] }
 0x3cc   : > { %951 = vst [vmem:[%s1994_s29] sm:$0x3] %v949_v22 }
 0x3d2   : > { %v997_v23 = vld [vmem:[%s283_s25] sm:$0x3] }
 0x3d3   : > { %998 = vst [vmem:[%s981_s24] sm:$0x3] %v997_v23 }
 0x3d4 PF: > { %1015 = sbr.rel (!%p1702_p3) target bundleno = 988 (0x3dc), region = 208  ;;  %s1016_s28 = sshrl.u32 (%p1702_p3), %s1688_s12, 3 }
 0x3d5   : > { %s1995_s27 = scalar_lea.vmem (%p1702_p3), [#allocation7], %s1725_s18  ;;  %s1513_s16 = sshll.u32 (%p1702_p3), %s1016_s28, 1 }
 0x3d6   : > { %s1018_s25 = scalar_lea.vmem (%p1702_p3), %s1986_s5, %s1513_s16 }
 0x3da   : > { %v1034_v24 = vld [vmem:[%s1995_s27] sm:$0x3] (%p1702_p3) }
 0x3db   : > { %1035 = vst [vmem:[%s1018_s25] sm:$0x3] %v1034_v24 }
 0x3dc PF: > { %s1514_s29 = sshll.u32 %s1688_s12, 3  ;;  %v1079_v25 = vld [vmem:[%s1731_s14] sm:$0xff]  ;;  %v1113_v26 = vld [vmem:[%s1734_s30] sm:$0xff] }
 0x3dd   : > { %v1147_v27 = vld [vmem:[%s1737_s17] sm:$0xff]  ;;  %s1051_s18 = scalar_lea.vmem %s1987_s6, %s1514_s29  ;;  %s1085_s26 = scalar_lea.vmem %s1988_s7, %s1514_s29  ;;  %v1181_v28 = vld [vmem:[%s1740_s20] sm:$0xff] }
 0x3de   : > { %1080 = vst [vmem:[%s1051_s18] sm:$0xff] %v1079_v25  ;;  %1114 = vst [vmem:[%s1085_s26] sm:$0xff] %v1113_v26  ;;  %s1119_s27 = scalar_lea.vmem %s1989_s8, %s1514_s29  ;;  %s1153_s14 = scalar_lea.vmem %s1990_s9, %s1514_s29 }
 0x3df   : > { %1148 = vst [vmem:[%s1119_s27] sm:$0xff] %v1147_v27  ;;  %1182 = vst [vmem:[%s1153_s14] sm:$0xff] %v1181_v28 }
 0x3e0 PF: > { %s1996_s17 = sld [smem:[#allocation25_spill]]  ;;  %p13_p13 = scmp.ge.s32.totalorder %s1691_s13, 4  }
 0x3e1   : > { %s1997_s30 = smov %s1605_s10  ;;  %s1999_s11 = smov %s1691_s13 }
 0x3e2   :  { %15 = sbr.rel (!%p13_p13) target bundleno = 2 (0x2), region = 516 }
 0x3e6   : > { %s1998_s10 = smov %s1996_s17 }

// kernel: scattering_forward.1
= control target key start
LH: loop header
LB: loop body
LE: loop exit
PB: predicated region body
PF: predicated region fallthrough
CT: control target
= control target key end

     0   :  { %vm19_vm0 = vcmask 130048   ;;  %s689_s12 = smov 8   ;;  %vm155_vm1 = vcmask 64512   ;;  %vm261_vm2 = vcmask 195584   ;;  %s878_s1 = inlined_call_operand.vmem [shape: f32[2,16,8], index: 1, kind: input, shape index: {}]   ;;  %s879_s0 = inlined_call_operand.vmem [shape: f32[2,48,16], index: 0, kind: input, shape index: {}]   ;;  %s880_s2 = inlined_call_operand.vmem [shape: f32[2,48,24], index: 2, kind: output, shape index: {}]  }
   0x1   :  { %v17_v0 = vld [vmem:[%s878_s1] sm:$0xff]  ;;  %v18_v1 = vld [vmem:[%s878_s1 + $0x8] sm:$0xff]  ;;  %v547_v4 = vld [vmem:[%s878_s1 + $0x10] sm:$0xff] }
   0x2   :  { %v11_v2 = vld [vmem:[%s879_s0] sm:$0xff]  ;;  %v651_v3 = vpack.c.bf16 %v18_v1, %v17_v0  ;;  %v548_v5 = vld [vmem:[%s878_s1 + $0x18] sm:$0xff]  ;;  %v726_v6 = vld [vmem:[%s879_s0 + $0x8] sm:$0xff] }
   0x3   :  { %603 = vmatprep.mubr.msk.f32.mxu0 %vm19_vm0, %v11_v2  ;;  %616 = vmatprep.mubr.msk.f32.mxu1 %vm19_vm0, %v11_v2  ;;  %v659_v7 = vpack.c.bf16 %v548_v5, %v547_v4  ;;  %v731_v8 = vld [vmem:[%s879_s0 + $0x10] sm:$0xff]  ;;  %v740_v9 = vld [vmem:[%s879_s0 + $0x18] sm:$0xff]  ;;  %v745_v10 = vld [vmem:[%s879_s0 + $0x20] sm:$0xff] }
   0x4   :  { %652 = vmatprep.subr.bf16.mxu0 %v651_v3  ;;  %v754_v11 = vld [vmem:[%s879_s0 + $0x28] sm:$0xff]  ;;  %v759_v12 = vld [vmem:[%s879_s0 + $0x30] sm:$0xff]  ;;  %v768_v13 = vld [vmem:[%s879_s0 + $0x38] sm:$0xff] }
   0x5   :  { %654 = vmatpush3.bf16.msra.mxu0 %v651_v3  ;;  %v773_v14 = vld [vmem:[%s879_s0 + $0x40] sm:$0xff]  ;;  %v782_v15 = vld [vmem:[%s879_s0 + $0x48] sm:$0xff]  ;;  %v787_v16 = vld [vmem:[%s879_s0 + $0x50] sm:$0xff] }
   0x6   :  { %660 = vmatprep.subr.bf16.mxu0 %v659_v7  ;;  %v796_v17 = vld [vmem:[%s879_s0 + $0x58] sm:$0xff]  ;;  %s690_s0 = smov 16  }
   0x8   :  { %604 = vmatmul.mubr.msk.f32.vlgmr.msra.gmra.mrb[0].mxu0 %vm19_vm0, %v726_v6 }
   0x9   :  { %606 = vmatprep.mubr.msk.f32.mxu0 %vm19_vm0, %v731_v8  ;;  %662 = vmatpush3.bf16.msra.mxu0 %v659_v7 }
   0xc   :  { %607 = vmatmul.mubr.msk.f32.gmra.mrb[2].mxu0 %vm19_vm0, %v740_v9 }
   0xd   :  { %609 = vmatprep.mubr.msk.f32.mxu0 %vm19_vm0, %v745_v10 }
  0x10   :  { %610 = vmatmul.mubr.msk.f32.gmra.mrb[4].mxu0 %vm19_vm0, %v754_v11 }
  0x11   :  { %629 = vmatprep.mubr.msk.f32.mxu0 %vm19_vm0, %v759_v12 }
  0x14   :  { %630 = vmatmul.mubr.msk.f32.vlgmr.msra.gmra.mrb[6].mxu0 %vm19_vm0, %v768_v13 }
  0x15   :  { %632 = vmatprep.mubr.msk.f32.mxu0 %vm19_vm0, %v773_v14 }
  0x18   :  { %633 = vmatmul.mubr.msk.f32.gmra.mrb[8].mxu0 %vm19_vm0, %v782_v15 }
  0x19   :  { %635 = vmatprep.mubr.msk.f32.mxu0 %vm19_vm0, %v787_v16 }
  0x1c   :  { %636 = vmatmul.mubr.msk.f32.gmra.mrb[10].mxu0 %vm19_vm0, %v796_v17 }
  0xdb   :  { %v605_v18 = vpop.f32.mrb[0].mxu0 }
  0xdc   :  { %v104_v19 = vpop.f32.mrb[1].mxu0  ;;  %v134_v45 = vand.u32 2147483647, %v605_v18 }
  0xdd   :  { %v133_v46 = vand.u32 2147483647, %v104_v19 }
  0xdf   :  { %v608_v20 = vpop.f32.mrb[2].mxu0 }
  0xe0   :  { %v136_v21 = vand.u32 2147483647, %v608_v20  ;;  %v114_v22 = vpop.f32.mrb[3].mxu0 }
  0xe1   :  { %v135_v23 = vand.u32 2147483647, %v114_v22 }
  0xe3   :  { %v611_v24 = vpop.f32.mrb[4].mxu0  ;;  %v669_v25 = vpack.i.bf16 %v136_v21, %v135_v23 }
  0xe4   :  { %v138_v26 = vand.u32 2147483647, %v611_v24  ;;  %v124_v27 = vpop.f32.mrb[5].mxu0 }
  0xe5   :  { %v137_v28 = vand.u32 2147483647, %v124_v27  ;;  %670 = vrot.lane.b32.xlu0 %v669_v25, %s689_s12 }
  0xe7   :  { %v674_v29 = vpack.i.bf16 %v138_v26, %v137_v28  ;;  %v631_v30 = vpop.f32.mrb[6].mxu0 }
  0xe8   :  { %v362_v31 = vpop.f32.mrb[7].mxu0  ;;  %v392_v58 = vand.u32 2147483647, %v631_v30 }
  0xe9   :  { %675 = vrot.lane.b32.xlu0 %v674_v29, %s690_s0  ;;  %v391_v59 = vand.u32 2147483647, %v362_v31 }
  0xeb   :  { %v634_v32 = vpop.f32.mrb[8].mxu0 }
  0xec   :  { %v394_v33 = vand.u32 2147483647, %v634_v32  ;;  %v372_v34 = vpop.f32.mrb[9].mxu0 }
  0xed   :  { %v393_v35 = vand.u32 2147483647, %v372_v34 }
  0xef   :  { %v637_v36 = vpop.f32.mrb[10].mxu0  ;;  %v679_v37 = vpack.i.bf16 %v394_v33, %v393_v35 }
  0xf0   :  { %v396_v38 = vand.u32 2147483647, %v637_v36  ;;  %v382_v39 = vpop.f32.mrb[11].mxu0 }
  0xf1   :  { %v395_v40 = vand.u32 2147483647, %v382_v39  ;;  %680 = vrot.lane.b32.xlu1 %v679_v37, %s689_s12 }
  0xf3   :  { %v684_v41 = vpack.i.bf16 %v396_v38, %v395_v40 }
  0xf5   :  { %685 = vrot.lane.b32.xlu1 %v684_v41, %s690_s0 }
 0x157   :  { %v671_v42 = vpop.permute.xlu0 %670 }
 0x158   :  { %v673_v43 = vunpack.i.h.bf16 %v671_v42  ;;  %v672_v44 = vunpack.i.l.bf16 %v671_v42 }
 0x15a   :  { %v156_v50 = vsel %vm155_vm1, %v133_v46, %v672_v44  ;;  %v157_v51 = vsel %vm155_vm1, %v134_v45, %v673_v43 }
 0x15b   :  { %v676_v47 = vpop.permute.xlu0 %675 }
 0x15c   :  { %v678_v48 = vunpack.i.h.bf16 %v676_v47  ;;  %v677_v49 = vunpack.i.l.bf16 %v676_v47 }
 0x15e   :  { %v158_v52 = vsel %vm19_vm0, %v156_v50, %v677_v49  ;;  %v159_v53 = vsel %vm19_vm0, %v157_v51, %v678_v48 }
 0x15f   :  { %v655_v54 = vpack.c.bf16 %v159_v53, %v158_v52 }
 0x161   :  { %656 = vmatprep.subr.bf16.mxu1 %v655_v54 }
 0x162   :  { %658 = vmatpush3.bf16.msra.mxu1 %v655_v54 }
 0x163   :  { %v681_v55 = vpop.permute.xlu1 %680 }
 0x164   :  { %v683_v56 = vunpack.i.h.bf16 %v681_v55  ;;  %v682_v57 = vunpack.i.l.bf16 %v681_v55 }
 0x165   :  { %617 = vmatmul.mubr.msk.f32.vlgmr.msra.gmra.mrb[0].mxu1 %vm19_vm0, %v726_v6 }
 0x166   :  { %619 = vmatprep.mubr.msk.f32.mxu1 %vm19_vm0, %v731_v8  ;;  %v414_v63 = vsel %vm155_vm1, %v392_v58, %v683_v56  ;;  %v413_v0 = vsel %vm155_vm1, %v391_v59, %v682_v57 }
 0x167   :  { %v686_v60 = vpop.permute.xlu1 %685 }
 0x168   :  { %v688_v61 = vunpack.i.h.bf16 %v686_v60  ;;  %v687_v62 = vunpack.i.l.bf16 %v686_v60 }
 0x169   :  { %620 = vmatmul.mubr.msk.f32.gmra.mrb[2].mxu1 %vm19_vm0, %v740_v9 }
 0x16a   :  { %v415_v1 = vsel %vm19_vm0, %v413_v0, %v687_v62  ;;  %v416_v2 = vsel %vm19_vm0, %v414_v63, %v688_v61  ;;  %622 = vmatprep.mubr.msk.f32.mxu1 %vm19_vm0, %v745_v10 }
 0x16b   :  { %v663_v3 = vpack.c.bf16 %v416_v2, %v415_v1 }
 0x16d   :  { %664 = vmatprep.subr.bf16.mxu1 %v663_v3  ;;  %623 = vmatmul.mubr.msk.f32.gmra.mrb[4].mxu1 %vm19_vm0, %v754_v11 }
 0x16e   :  { %666 = vmatpush3.bf16.msra.mxu1 %v663_v3  ;;  %642 = vmatprep.mubr.msk.f32.mxu1 %vm19_vm0, %v759_v12 }
 0x171   :  { %643 = vmatmul.mubr.msk.f32.vlgmr.msra.gmra.mrb[6].mxu1 %vm19_vm0, %v768_v13 }
 0x172   :  { %645 = vmatprep.mubr.msk.f32.mxu1 %vm19_vm0, %v773_v14 }
 0x175   :  { %646 = vmatmul.mubr.msk.f32.gmra.mrb[8].mxu1 %vm19_vm0, %v782_v15 }
 0x176   :  { %648 = vmatprep.mubr.msk.f32.mxu1 %vm19_vm0, %v787_v16 }
 0x179   :  { %649 = vmatmul.mubr.msk.f32.gmra.mrb[10].mxu1 %vm19_vm0, %v796_v17 }
 0x238   :  { %v618_v4 = vpop.f32.mrb[0].mxu1 }
 0x239   :  { %v256_v5 = vand.u32 2147483647, %v618_v4  ;;  %v226_v6 = vpop.f32.mrb[1].mxu1 }
 0x23a   :  { %v255_v7 = vand.u32 2147483647, %v226_v6 }
 0x23b   :  { %263 = vst.msk [vmem:[%s880_s2 + $0x8] sm:$0xff] %vm261_vm2, %v256_v5 }
 0x23c   :  { %262 = vst.msk [vmem:[%s880_s2] sm:$0xff] %vm261_vm2, %v255_v7  ;;  %v621_v8 = vpop.f32.mrb[2].mxu1 }
 0x23d   :  { %v258_v9 = vand.u32 2147483647, %v621_v8  ;;  %v236_v10 = vpop.f32.mrb[3].mxu1 }
 0x23e   :  { %v257_v11 = vand.u32 2147483647, %v236_v10 }
 0x23f   :  { %265 = vst.msk [vmem:[%s880_s2 + $0x18] sm:$0xff] %vm261_vm2, %v258_v9 }
 0x240   :  { %264 = vst.msk [vmem:[%s880_s2 + $0x10] sm:$0xff] %vm261_vm2, %v257_v11  ;;  %v624_v12 = vpop.f32.mrb[4].mxu1 }
 0x241   :  { %v260_v13 = vand.u32 2147483647, %v624_v12  ;;  %v246_v14 = vpop.f32.mrb[5].mxu1 }
 0x242   :  { %v259_v15 = vand.u32 2147483647, %v246_v14 }
 0x243   :  { %267 = vst.msk [vmem:[%s880_s2 + $0x28] sm:$0xff] %vm261_vm2, %v260_v13 }
 0x244   :  { %266 = vst.msk [vmem:[%s880_s2 + $0x20] sm:$0xff] %vm261_vm2, %v259_v15  ;;  %v644_v16 = vpop.f32.mrb[6].mxu1 }
 0x245   :  { %v513_v17 = vand.u32 2147483647, %v644_v16  ;;  %v483_v18 = vpop.f32.mrb[7].mxu1 }
 0x246   :  { %v512_v19 = vand.u32 2147483647, %v483_v18 }
 0x247   :  { %562 = vst.msk [vmem:[%s880_s2 + $0x38] sm:$0xff] %vm261_vm2, %v513_v17 }
 0x248   :  { %561 = vst.msk [vmem:[%s880_s2 + $0x30] sm:$0xff] %vm261_vm2, %v512_v19  ;;  %v647_v20 = vpop.f32.mrb[8].mxu1 }
 0x249   :  { %v515_v21 = vand.u32 2147483647, %v647_v20  ;;  %v493_v22 = vpop.f32.mrb[9].mxu1 }
 0x24a   :  { %v514_v23 = vand.u32 2147483647, %v493_v22 }
 0x24b   :  { %564 = vst.msk [vmem:[%s880_s2 + $0x48] sm:$0xff] %vm261_vm2, %v515_v21 }
 0x24c   :  { %563 = vst.msk [vmem:[%s880_s2 + $0x40] sm:$0xff] %vm261_vm2, %v514_v23  ;;  %v650_v24 = vpop.f32.mrb[10].mxu1 }
 0x24d   :  { %v517_v25 = vand.u32 2147483647, %v650_v24  ;;  %v503_v26 = vpop.f32.mrb[11].mxu1 }
 0x24e   :  { %v516_v27 = vand.u32 2147483647, %v503_v26 }
 0x24f   :  { %566 = vst.msk [vmem:[%s880_s2 + $0x58] sm:$0xff] %vm261_vm2, %v517_v25 }
 0x250   :  { %565 = vst.msk [vmem:[%s880_s2 + $0x50] sm:$0xff] %vm261_vm2, %v516_v27 }

</bundles_post_ra>
